<compile_context>
chip_gen: v6e
topology: v6e:2x2x1
jax: 0.10.0
libtpu: 0.0.40
codegen_flags: <defaults>
</compile_context>

<pallas_src>
import jax
import jax.numpy as jnp
from jax.experimental import pallas as pl
from jax.experimental.pallas import tpu as pltpu


def _round_up(n, m):
    return (n + m - 1) // m * m


def _vmem_budget_bytes():
    """Generation-aware scoped-VMEM budget: ~85% of physical (headroom for
    compiler-internal scratch). Fallback is v7x-safe (64 MiB per TensorCore)."""
    try:
        cap = pltpu.get_tpu_info().vmem_capacity_bytes
    except Exception:
        cap = 64 * 1024 * 1024
    return int(cap * 0.85)


# --------------------------------------------------------------------------
# Kernels
# --------------------------------------------------------------------------
def _ffn_resident_kernel(x_ref, w1t_ref, b1_ref, w2t_ref, b2_ref, o_ref):
    # Weights resident in VMEM (single-buffered); x cast to the MXU compute
    # dtype in-kernel (VPU filler hidden under the MXU) -> no wrapper HBM pass.
    x = x_ref[...].astype(w1t_ref.dtype)                       # (tm, E)
    h = jnp.dot(x, w1t_ref[...], preferred_element_type=jnp.float32)   # (tm, H)
    h = jnp.maximum(h + b1_ref[...], 0.0)                      # f32 epilogue (v5e-friendly)
    # dropout: identity in eval mode (see TODO at top of file).
    y = jnp.dot(h.astype(w2t_ref.dtype), w2t_ref[...],
                preferred_element_type=jnp.float32)             # (tm, E)
    o_ref[...] = (y + b2_ref[...]).astype(o_ref.dtype)


def _ffn_htiled_kernel(x_ref, w1t_ref, b1_ref, w2t_ref, b2_ref, o_ref, acc_ref):
    # Hidden-dim-tiled variant: weights streamed per H slab, second matmul
    # accumulated into a (tm, E) f32 VMEM scratch.  Used when resident bf16
    # weights (16*E^2 bytes) no longer fit the VMEM budget (v7x, E >~ 1536).
    k = pl.program_id(1)

    @pl.when(k == 0)
    def _():
        acc_ref[...] = jnp.zeros_like(acc_ref)

    x = x_ref[...].astype(w1t_ref.dtype)                        # (tm, E)
    h = jnp.dot(x, w1t_ref[...], preferred_element_type=jnp.float32)   # (tm, th)
    h = jnp.maximum(h + b1_ref[...], 0.0)
    acc_ref[...] += jnp.dot(h.astype(w2t_ref.dtype), w2t_ref[...],
                            preferred_element_type=jnp.float32)  # (tm, E)

    @pl.when(k == pl.num_programs(1) - 1)
    def _():
        o_ref[...] = (acc_ref[...] + b2_ref[...]).astype(o_ref.dtype)


# --------------------------------------------------------------------------
# Wrapper
# --------------------------------------------------------------------------
def prepare_ffn_params(w1, b1, w2, b2, *, compute_dtype=jnp.bfloat16):
    """One-time weight preparation (transpose + cast to compute dtype).

    Call ONCE per model and reuse across forward calls: doing this per call
    costs a full HBM read+write of both weight matrices in separate XLA ops.
    w1: (H, E) torch layout, b1: (H,), w2: (E, H), b2: (E,), H = 4E.
    """
    H, E = w1.shape
    assert w2.shape == (E, H) and b1.shape == (H,) and b2.shape == (E,)
    return {
        "w1t": jnp.asarray(w1, compute_dtype).T,             # (E, H)
        "b1": jnp.asarray(b1, jnp.float32).reshape(1, H),
        "w2t": jnp.asarray(w2, compute_dtype).T,             # (H, E)
        "b2": jnp.asarray(b2, jnp.float32).reshape(1, E),
    }


def feed_forward(x, params, *, tm=None, out_dtype=None, force_htile=False, th=None):
    """Fused FFN forward: y = relu(x @ W1^T + b1) @ W2^T + b2 (dropout = identity).

    x:      (batch, seq, E)
    params: dict from prepare_ffn_params (weights already transposed / cast).
    Returns (batch, seq, E) in out_dtype (default x.dtype; pass jnp.bfloat16 to
    halve output HBM writeback if downstream allows).
    """
    w1t, b1, w2t, b2 = params["w1t"], params["b1"], params["w2t"], params["b2"]
    batch, seq, E = x.shape
    E_in, H = w1t.shape
    assert E_in == E and w2t.shape == (H, E) and b1.shape == (1, H) and b2.shape == (1, E)
    # Lane-dense output requires E % 128 == 0; prefer multiples of 256 on
    # v6e/v7x (2x256^2 MXU) for full systolic-array width at production sizes.
    assert E % 128 == 0, "embedding_dim must be a multiple of 128"

    if out_dtype is None:
        out_dtype = x.dtype
    cd_size = jnp.dtype(w1t.dtype).itemsize
    x_size = jnp.dtype(x.dtype).itemsize
    o_size = jnp.dtype(out_dtype).itemsize

    T = batch * seq
    budget = _vmem_budget_bytes()

    # ----- strategy selection: weights-resident vs. H-tiled (streamed) -----
    def resident_footprint(tm_):
        return (2 * E * H * cd_size                  # W1^T + W2^T, single-buffered
                + 4 * (H + E)                        # biases (f32)
                + 2 * tm_ * E * (x_size + o_size)    # double-buffered x / out tiles
                + tm_ * (H + E) * 4)                 # f32 h / y temporaries

    def htile_footprint(tm_, th_):
        return (2 * 2 * E * th_ * cd_size            # streamed W1^T/W2^T slabs (2 bufs each)
                + 2 * 4 * th_ + 4 * E                # streamed b1 slabs + resident b2
                + 2 * tm_ * E * (x_size + o_size)    # double-buffered x / out tiles
                + tm_ * E * 4                        # f32 accumulator scratch
                + tm_ * th_ * 4)                     # f32 h temporary

    tm_resident = _round_up(min(tm or 256, _round_up(T, 16)), 16)
    use_resident = (not force_htile) and resident_footprint(tm_resident) <= budget

    if use_resident:
        tm = tm_resident
    else:
        # Streamed weights: larger token tile keeps arithmetic intensity above
        # the HBM roofline (v7x break-even ~310 token rows per streamed byte).
        tm = _round_up(min(tm or 512, _round_up(T, 16)), 16)
        if th is None:
            for cand in (2048, 1024, 512, 256, 128):
                if H % cand == 0 and htile_footprint(tm, cand) <= budget:
                    th = cand
                    break
            else:
                th = 128
        assert H % th == 0, "hidden width must be divisible by the H tile"

    T_pad = _round_up(T, tm)
    x2d = x.reshape(T, E)
    if T_pad != T:                                   # skip the pad pass when aligned
        x2d = jnp.pad(x2d, ((0, T_pad - T), (0, 0)))

    if use_resident:
        def _const(shape):
            # Grid-invariant operand: never re-fetched, single VMEM buffer.
            return pl.BlockSpec(shape, lambda i: (0, 0), pipeline_mode=pl.Buffered(1))

        cost = pl.CostEstimate(
            flops=4 * T_pad * E * H, transcendentals=0,
            bytes_accessed=(T_pad * E * (x_size + o_size)
                            + 2 * E * H * cd_size + 4 * (H + E)))

        out2d = pl.pallas_call(
            _ffn_resident_kernel,
            out_shape=jax.ShapeDtypeStruct((T_pad, E), out_dtype),
            grid_spec=pltpu.PrefetchScalarGridSpec(
                num_scalar_prefetch=0,
                grid=(T_pad // tm,),
                in_specs=[
                    pl.BlockSpec((tm, E), lambda i: (i, 0)),   # x tile (pipelined)
                    _const((E, H)),                            # W1^T (resident)
                    _const((1, H)),                            # b1
                    _const((H, E)),                            # W2^T (resident)
                    _const((1, E)),                            # b2
                ],
                out_specs=pl.BlockSpec((tm, E), lambda i: (i, 0)),
            ),
            compiler_params=pltpu.CompilerParams(
                dimension_semantics=("parallel",),             # megacore / 2-TC sharding
                vmem_limit_bytes=budget,
            ),
            cost_estimate=cost,
        )(x2d, w1t, b1, w2t, b2)
    else:
        cost = pl.CostEstimate(
            flops=4 * T_pad * E * H, transcendentals=0,
            bytes_accessed=(T_pad * E * (x_size + o_size)
                            + (T_pad // tm) * 2 * E * H * cd_size  # weights re-streamed
                            + 4 * (H + E)))

        out2d = pl.pallas_call(
            _ffn_htiled_kernel,
            out_shape=jax.ShapeDtypeStruct((T_pad, E), out_dtype),
            grid_spec=pltpu.PrefetchScalarGridSpec(
                num_scalar_prefetch=0,
                grid=(T_pad // tm, H // th),
                in_specs=[
                    pl.BlockSpec((tm, E), lambda i, k: (i, 0)),   # x tile (held across k)
                    # TODO(synk): bump streamed weight slabs to pl.Buffered(3) on v7x
                    #             if xprof shows exposed DMA at H-slab boundaries.
                    pl.BlockSpec((E, th), lambda i, k: (0, k)),   # W1^T slab
                    pl.BlockSpec((1, th), lambda i, k: (0, k)),   # b1 slab
                    pl.BlockSpec((th, E), lambda i, k: (k, 0)),   # W2^T slab
                    pl.BlockSpec((1, E), lambda i, k: (0, 0),
                                 pipeline_mode=pl.Buffered(1)),   # b2 (resident)
                ],
                out_specs=pl.BlockSpec((tm, E), lambda i, k: (i, 0)),
                scratch_shapes=[pltpu.VMEM((tm, E), jnp.float32)],
            ),
            compiler_params=pltpu.CompilerParams(
                dimension_semantics=("parallel", "arbitrary"),
                vmem_limit_bytes=budget,
            ),
            cost_estimate=cost,
        )(x2d, w1t, b1, w2t, b2)

    return out2d[:T].reshape(batch, seq, E)


# --------------------------------------------------------------------------
# Pure-JAX reference (mirrors the kernel's numerics: bf16 matmul operands,
# f32 accumulation and epilogue).
# --------------------------------------------------------------------------
def _ref_forward(x, w1, b1, w2, b2, compute_dtype=jnp.bfloat16):
    f32 = jnp.float32
    xc = x.astype(compute_dtype).astype(f32)
    w1c = w1.astype(compute_dtype).astype(f32)
    w2c = w2.astype(compute_dtype).astype(f32)
    h = jnp.maximum(jnp.einsum("bse,he->bsh", xc, w1c) + b1, 0.0)
    h = h.astype(compute_dtype).astype(f32)
    return jnp.einsum("bsh,eh->bse", h, w2c) + b2


if __name__ == "__main__":
    config = {"embedding_dim": 128, "drop_rate": 0.1}
    E = config["embedding_dim"]
    H = 4 * E
    batch, seq = 2, 8

    key = jax.random.PRNGKey(0)
    kx, k1, k2, k3, k4 = jax.random.split(key, 5)

    # Deterministic init mimicking torch.nn.Linear: U(-1/sqrt(fan_in), +1/sqrt(fan_in)).
    lim1 = 1.0 / (E ** 0.5)
    lim2 = 1.0 / (H ** 0.5)
    x = jax.random.normal(kx, (batch, seq, E), dtype=jnp.float32)
    w1 = jax.random.uniform(k1, (H, E), jnp.float32, -lim1, lim1)   # linear1 weight
    b1 = jax.random.uniform(k2, (H,), jnp.float32, -lim1, lim1)     # linear1 bias
    w2 = jax.random.uniform(k3, (E, H), jnp.float32, -lim2, lim2)   # linear2 weight
    b2 = jax.random.uniform(k4, (E,), jnp.float32, -lim2, lim2)     # linear2 bias

    params = prepare_ffn_params(w1, b1, w2, b2)   # once per model, reused every call
    ref = _ref_forward(x, w1, b1, w2, b2)

    # Weights-resident path (default for this small E).
    out = jax.block_until_ready(feed_forward(x, params))
    assert out.shape == (batch, seq, E)
    assert jnp.allclose(out, ref, atol=1e-2, rtol=1e-2), "resident path mismatch"

    # Also exercise the H-tiled (streamed-weights) path used for large E / v7x.
    out_ht = jax.block_until_ready(feed_forward(x, params, force_htile=True, th=128))
    assert jnp.allclose(out_ht, ref, atol=1e-2, rtol=1e-2), "H-tiled path mismatch"

    print("KERNEL_OK")
</pallas_src>

<mosaic_0001>
module attributes {stable_mosaic.version = 11 : i64} {
  func.func @_ffn_resident_kernel(%arg0: i32, %arg1: memref<16x128xf32, #tpu.memory_space<vmem>>, %arg2: memref<128x512xbf16, #tpu.memory_space<vmem>>, %arg3: memref<1x512xf32, #tpu.memory_space<vmem>>, %arg4: memref<512x128xbf16, #tpu.memory_space<vmem>>, %arg5: memref<1x128xf32, #tpu.memory_space<vmem>>, %arg6: memref<16x128xf32, #tpu.memory_space<vmem>>) attributes {dimension_semantics = [#tpu.dimension_semantics<parallel>], iteration_bounds = array<i64: 1>, scalar_prefetch = 0 : i64, scratch_operands = 0 : i64, tpu.core_type = #tpu.core_type<tc>, window_params = [{transform_indices = @transform_0, window_bounds = array<i64: 16, 128>}, {pipeline_mode = #tpu.pipeline_mode<synchronous>, transform_indices = @transform_1, window_bounds = array<i64: 128, 512>}, {pipeline_mode = #tpu.pipeline_mode<synchronous>, transform_indices = @transform_2, window_bounds = array<i64: 1, 512>}, {pipeline_mode = #tpu.pipeline_mode<synchronous>, transform_indices = @transform_3, window_bounds = array<i64: 512, 128>}, {pipeline_mode = #tpu.pipeline_mode<synchronous>, transform_indices = @transform_4, window_bounds = array<i64: 1, 128>}, {transform_indices = @transform_5, window_bounds = array<i64: 16, 128>}]} {
    %c0 = arith.constant 0 : index
    %c0_0 = arith.constant 0 : index
    %0 = vector.load %arg1[%c0, %c0_0] : memref<16x128xf32, #tpu.memory_space<vmem>>, vector<16x128xf32>
    %1 = arith.truncf %0 : vector<16x128xf32> to vector<16x128xbf16>
    %c0_1 = arith.constant 0 : index
    %c0_2 = arith.constant 0 : index
    %2 = vector.load %arg2[%c0_1, %c0_2] : memref<128x512xbf16, #tpu.memory_space<vmem>>, vector<128x512xbf16>
    %cst = arith.constant dense<0.000000e+00> : vector<16x512xf32>
    %3 = tpu.matmul %1, %2, %cst {dimension_numbers = #tpu.dot_dimension_numbers<[1], [0], [0], [1], [0, 0, 1, 1], [], []>} : vector<16x128xbf16>, vector<128x512xbf16>, vector<16x512xf32> -> vector<16x512xf32>
    %c0_3 = arith.constant 0 : index
    %c0_4 = arith.constant 0 : index
    %4 = vector.load %arg3[%c0_3, %c0_4] : memref<1x512xf32, #tpu.memory_space<vmem>>, vector<1x512xf32>
    %5 = vector.broadcast %4 : vector<1x512xf32> to vector<16x512xf32>
    %6 = arith.addf %3, %5 : vector<16x512xf32>
    %cst_5 = arith.constant 0.000000e+00 : f32
    %7 = vector.broadcast %cst_5 : f32 to vector<16x512xf32>
    %8 = arith.maximumf %6, %7 : vector<16x512xf32>
    %9 = arith.truncf %8 : vector<16x512xf32> to vector<16x512xbf16>
    %c0_6 = arith.constant 0 : index
    %c0_7 = arith.constant 0 : index
    %10 = vector.load %arg4[%c0_6, %c0_7] : memref<512x128xbf16, #tpu.memory_space<vmem>>, vector<512x128xbf16>
    %cst_8 = arith.constant dense<0.000000e+00> : vector<16x128xf32>
    %11 = tpu.matmul %9, %10, %cst_8 {dimension_numbers = #tpu.dot_dimension_numbers<[1], [0], [0], [1], [0, 0, 1, 1], [], []>} : vector<16x512xbf16>, vector<512x128xbf16>, vector<16x128xf32> -> vector<16x128xf32>
    %c0_9 = arith.constant 0 : index
    %c0_10 = arith.constant 0 : index
    %12 = vector.load %arg5[%c0_9, %c0_10] : memref<1x128xf32, #tpu.memory_space<vmem>>, vector<1x128xf32>
    %13 = vector.broadcast %12 : vector<1x128xf32> to vector<16x128xf32>
    %14 = arith.addf %11, %13 : vector<16x128xf32>
    %c0_11 = arith.constant 0 : index
    %c0_12 = arith.constant 0 : index
    %15 = vector.load %arg6[%c0_11, %c0_12] : memref<16x128xf32, #tpu.memory_space<vmem>>, vector<16x128xf32>
    tpu.vector_store %arg6[%c0_11, %c0_12], %14 {strides = array<i32>} : memref<16x128xf32, #tpu.memory_space<vmem>>, vector<16x128xf32>,
    return
  }
  func.func @transform_0(%arg0: i32) -> (i32, i32) {
    %c0_i32 = arith.constant 0 : i32
    %c0_i32_0 = arith.constant 0 : i32
    return %arg0, %c0_i32 : i32, i32
  }
  func.func @transform_1(%arg0: i32) -> (i32, i32) {
    %c0_i32 = arith.constant 0 : i32
    %c0_i32_0 = arith.constant 0 : i32
    %c0_i32_1 = arith.constant 0 : i32
    return %c0_i32, %c0_i32_0 : i32, i32
  }
  func.func @transform_2(%arg0: i32) -> (i32, i32) {
    %c0_i32 = arith.constant 0 : i32
    %c0_i32_0 = arith.constant 0 : i32
    %c0_i32_1 = arith.constant 0 : i32
    return %c0_i32, %c0_i32_0 : i32, i32
  }
  func.func @transform_3(%arg0: i32) -> (i32, i32) {
    %c0_i32 = arith.constant 0 : i32
    %c0_i32_0 = arith.constant 0 : i32
    %c0_i32_1 = arith.constant 0 : i32
    return %c0_i32, %c0_i32_0 : i32, i32
  }
  func.func @transform_4(%arg0: i32) -> (i32, i32) {
    %c0_i32 = arith.constant 0 : i32
    %c0_i32_0 = arith.constant 0 : i32
    %c0_i32_1 = arith.constant 0 : i32
    return %c0_i32, %c0_i32_0 : i32, i32
  }
  func.func @transform_5(%arg0: i32) -> (i32, i32) {
    %c0_i32 = arith.constant 0 : i32
    %c0_i32_0 = arith.constant 0 : i32
    return %arg0, %c0_i32 : i32, i32
  }
}

</mosaic_0001>

<bundles_post_ra>
// kernel: tpu_custom_call.1
= control target key start
LH: loop header
LB: loop body
LE: loop exit
PB: predicated region body
PF: predicated region fallthrough
CT: control target
= control target key end

     0   :  { %10 = vsyncpa [#allocation3], 0  ;;  %s1131_s0 = inlined_call_operand.hbm [shape: f32[16,128], index: 0, kind: input, shape index: {}]   ;;  %s1132_s1 = inlined_call_operand.hbm [shape: bf16[128,512], index: 1, kind: input, shape index: {}]   ;;  %s1133_s2 = inlined_call_operand.hbm [shape: f32[1,512], index: 2, kind: input, shape index: {}]   ;;  %s1134_s3 = inlined_call_operand.hbm [shape: bf16[512,128], index: 3, kind: input, shape index: {}]   ;;  %s1135_s4 = inlined_call_operand.vmem [shape: f32[1,128], index: 4, kind: input, shape index: {}]   ;;  %s1136_s5 = inlined_call_operand.hbm [shape: f32[16,128], index: 5, kind: output, shape index: {}]  }
   0x1   :  { %11 = vsyncpa [#allocation6], 0 }
   0x2   :  { %12 = vsyncpa [#allocation9], 0 }
   0x3   :  { %13 = vsyncpa [#allocation4], 0  ;;  %s1065_s18 = smov [#allocation5]  }
   0x4   :  { %s31_s19 = sshll.u32 %s1065_s18, 4  ;;  %s32_s19 = int_to_ptr.vmem [resolvable:$true] %s31_s19 }
   0x5   :  { %s965_s20 = scalar_lea.vmem %s32_s19, 4096  ;;  %p970_p1 = scmp.lt.s32.totalorder %s32_s19, %s32_s19 }
   0x6   :  { %p966_p0 = scmp.ne.s32.totalorder %s32_s19, %s965_s20  ;;  %p971_p2 = scmp.lt.s32.totalorder %s965_s20, %s965_s20 }
   0x8   :  { %p972_p3 = por %p971_p2, %p970_p1 }
   0xa   :  { %p973_p4 = pnand %p972_p3, %p966_p0 }
   0xc   :  { %976 = shalt.err (!%p973_p4)
}
   0xd   :  { %s1066_s21 = smov 256   ;;  %s1067_s22 = smov 16  }
   0xe   :  { %37 = dma.hbm_to_vmem [thread:$0]  %s1132_s1, 4096, %s32_s19, [#allocation6], %s1066_s21, %s1066_s21, %s1067_s22  }
   0xf   :  { %s1068_s25 = smov [#allocation2]  }
  0x10   :  { %s19_s26 = sshll.u32 %s1068_s25, 4  ;;  %s20_s26 = int_to_ptr.vmem [resolvable:$true] %s19_s26 }
  0x11   :  { %s985_s27 = scalar_lea.vmem %s20_s26, 256  ;;  %p990_p6 = scmp.lt.s32.totalorder %s20_s26, %s20_s26 }
  0x12   :  { %p986_p5 = scmp.ne.s32.totalorder %s20_s26, %s985_s27  ;;  %p991_p7 = scmp.lt.s32.totalorder %s985_s27, %s985_s27 }
  0x14   :  { %p992_p8 = por %p991_p7, %p990_p6 }
  0x16   :  { %p993_p9 = pnand %p992_p8, %p986_p5 }
  0x18   :  { %996 = shalt.err (!%p993_p9)
}
  0x19   :  { %s1069_s28 = smov 128   ;;  %s1070_s29 = smov 8  }
  0x1a   :  { %25 = dma.hbm_to_vmem [thread:$0]  %s1131_s0, 256, %s20_s26, [#allocation3], %s1069_s28, %s1069_s28, %s1070_s29  }
  0x1b   :  { %s1071_s1 = smov [#allocation7]   ;;  %s1072_s8 = smov [#allocation8]  }
  0x1c   :  { %s44_s7 = sshll.u32 %s1071_s1, 4  ;;  %s53_s9 = sshll.u32 %s1072_s8, 4  ;;  %s45_s7 = int_to_ptr.vmem [resolvable:$true] %s44_s7  ;;  %s54_s9 = int_to_ptr.vmem [resolvable:$true] %s53_s9 }
  0x1d   :  { %s1005_s10 = scalar_lea.vmem %s45_s7, 64  ;;  %p1010_p11 = scmp.lt.s32.totalorder %s45_s7, %s45_s7 }
  0x1e   :  { %p1006_p10 = scmp.ne.s32.totalorder %s45_s7, %s1005_s10  ;;  %p1011_p12 = scmp.lt.s32.totalorder %s1005_s10, %s1005_s10 }
  0x20   :  { %p1012_p13 = por %p1011_p12, %p1010_p11 }
  0x22   :  { %p1013_p0 = pnand %p1012_p13, %p1006_p10 }
  0x24   :  { %1016 = shalt.err (!%p1013_p0)
}
  0x25   :  { %47 = dma.hbm_to_vmem [thread:$0]  %s1133_s2, 64, %s45_s7, [#allocation6]  }
  0x26   :  { %s1025_s13 = scalar_lea.vmem %s54_s9, 4096  ;;  %p1030_p2 = scmp.lt.s32.totalorder %s54_s9, %s54_s9 }
  0x27   :  { %p1026_p1 = scmp.ne.s32.totalorder %s54_s9, %s1025_s13  ;;  %p1031_p3 = scmp.lt.s32.totalorder %s1025_s13, %s1025_s13 }
  0x29   :  { %p1032_p4 = por %p1031_p3, %p1030_p2 }
  0x2b   :  { %p1033_p5 = pnand %p1032_p4, %p1026_p1 }
  0x2d   :  { %1036 = shalt.err (!%p1033_p5)
}
  0x2e   :  { %s1073_s0 = smov 64   ;;  %s1074_s14 = smov 4  }
  0x2f   :  { %59 = dma.hbm_to_vmem [thread:$0]  %s1134_s3, 4096, %s54_s9, [#allocation9], %s1073_s0, %s1073_s0, %s1074_s14  }
  0x30   :  { %1057 = dma.done.wait [#allocation3], 256  }
  0x31   :  { %1058 = vsyncadd [#allocation3], 4294967040 }
  0x32   :  { %1059 = dma.done.wait [#allocation6], 4160  }
  0x33   :  { %1060 = vsyncadd [#allocation6], 4294963136 }
  0x34   :  { %1061 = dma.done.wait [#allocation9], 4096  }
  0x35   :  { %1062 = vsyncadd [#allocation9], 4294963200  ;;  %v1075_v0 = vmov 0   ;;  %v877_v1 = vld [vmem:[#allocation5 + $0xe4] ss:$16 sps:$4 sm:$0xff]   ;;  %v76_v34 = vld [vmem:[#allocation2 + $0x8] sm:$0xff] }
  0x36   :  { %324 = vmatprep.mubr.bf16.mxu0 %v1075_v0  ;;  %367 = vmatprep.mubr.bf16.mxu1 %v1075_v0  ;;  %v879_v2 = vld [vmem:[#allocation5 + $0xec] ss:$16 sps:$4 sm:$0xff]   ;;  %v881_v3 = vld [vmem:[#allocation5 + $0xe0] ss:$16 sps:$4 sm:$0xff]   ;;  %v882_v4 = vld [vmem:[#allocation5 + $0xe8] ss:$16 sps:$4 sm:$0xff]  }
  0x37   :  { %292 = vmatprep.subr.bf16.mxu0 %v877_v1  ;;  %335 = vmatprep.subr.bf16.mxu1 %v879_v2  ;;  %v883_v5 = vld [vmem:[#allocation5 + $0xc4] ss:$16 sps:$4 sm:$0xff]   ;;  %v885_v6 = vld [vmem:[#allocation5 + $0xcc] ss:$16 sps:$4 sm:$0xff]   ;;  %v887_v7 = vld [vmem:[#allocation5 + $0xc0] ss:$16 sps:$4 sm:$0xff]  }
  0x38   :  { %293 = vmatpush1.bf16.msra.mxu0 %v881_v3  ;;  %336 = vmatpush1.bf16.msra.mxu1 %v882_v4  ;;  %v888_v8 = vld [vmem:[#allocation5 + $0xc8] ss:$16 sps:$4 sm:$0xff]   ;;  %v889_v9 = vld [vmem:[#allocation5 + $0xa4] ss:$16 sps:$4 sm:$0xff]   ;;  %v891_v10 = vld [vmem:[#allocation5 + $0xac] ss:$16 sps:$4 sm:$0xff]   ;;  %v112_v4 = vlaneseq }
  0x39   :  { %294 = vmatprep.subr.bf16.mxu0 %v883_v5  ;;  %337 = vmatprep.subr.bf16.mxu1 %v885_v6  ;;  %v893_v11 = vld [vmem:[#allocation5 + $0xa0] ss:$16 sps:$4 sm:$0xff]   ;;  %v894_v12 = vld [vmem:[#allocation5 + $0xa8] ss:$16 sps:$4 sm:$0xff]   ;;  %v895_v13 = vld [vmem:[#allocation5 + $0x84] ss:$16 sps:$4 sm:$0xff]  }
  0x3a   :  { %v897_v14 = vld [vmem:[#allocation5 + $0x8c] ss:$16 sps:$4 sm:$0xff]   ;;  %v899_v15 = vld [vmem:[#allocation5 + $0x80] ss:$16 sps:$4 sm:$0xff]   ;;  %v900_v16 = vld [vmem:[#allocation5 + $0x88] ss:$16 sps:$4 sm:$0xff]  }
  0x3b   :  { %v901_v17 = vld [vmem:[#allocation5 + $0x64] ss:$16 sps:$4 sm:$0xff]   ;;  %v903_v18 = vld [vmem:[#allocation5 + $0x6c] ss:$16 sps:$4 sm:$0xff]   ;;  %v905_v19 = vld [vmem:[#allocation5 + $0x60] ss:$16 sps:$4 sm:$0xff]  }
  0x3c   :  { %295 = vmatpush1.bf16.msra.mxu0 %v887_v7  ;;  %338 = vmatpush1.bf16.msra.mxu1 %v888_v8  ;;  %v906_v20 = vld [vmem:[#allocation5 + $0x68] ss:$16 sps:$4 sm:$0xff]   ;;  %v907_v21 = vld [vmem:[#allocation5 + $0x44] ss:$16 sps:$4 sm:$0xff]   ;;  %v909_v22 = vld [vmem:[#allocation5 + $0x4c] ss:$16 sps:$4 sm:$0xff]  }
  0x3d   :  { %296 = vmatprep.subr.bf16.mxu0 %v889_v9  ;;  %339 = vmatprep.subr.bf16.mxu1 %v891_v10  ;;  %v911_v23 = vld [vmem:[#allocation5 + $0x40] ss:$16 sps:$4 sm:$0xff]   ;;  %v912_v24 = vld [vmem:[#allocation5 + $0x48] ss:$16 sps:$4 sm:$0xff]   ;;  %v913_v25 = vld [vmem:[#allocation5 + $0x24] ss:$16 sps:$4 sm:$0xff]  }
  0x3e   :  { %v915_v26 = vld [vmem:[#allocation5 + $0x2c] ss:$16 sps:$4 sm:$0xff]   ;;  %v917_v27 = vld [vmem:[#allocation5 + $0x20] ss:$16 sps:$4 sm:$0xff]   ;;  %v918_v28 = vld [vmem:[#allocation5 + $0x28] ss:$16 sps:$4 sm:$0xff]  }
  0x3f   :  { %v919_v29 = vld [vmem:[#allocation5 + $0x4] ss:$16 sps:$4 sm:$0xff]   ;;  %v921_v30 = vld [vmem:[#allocation5 + $0xc] ss:$16 sps:$4 sm:$0xff]   ;;  %v923_v31 = vld [vmem:[#allocation5] ss:$16 sps:$4 sm:$0xff]  }
  0x40   :  { %297 = vmatpush1.bf16.msra.mxu0 %v893_v11  ;;  %340 = vmatpush1.bf16.msra.mxu1 %v894_v12  ;;  %v924_v32 = vld [vmem:[#allocation5 + $0x8] ss:$16 sps:$4 sm:$0xff]   ;;  %v75_v33 = vld [vmem:[#allocation2] sm:$0xff]  ;;  %v925_v35 = vld [vmem:[#allocation8 + $0x78] sm:$0xff]   ;;  %v113_v5 = vshrl.u32 %v112_v4, 7  ;;  %s1076_s17 = smov [#allocation10]  }
  0x41   :  { %298 = vmatprep.subr.bf16.mxu0 %v895_v13  ;;  %341 = vmatprep.subr.bf16.mxu1 %v897_v14  ;;  %v926_v36 = vld [vmem:[#allocation8 + $0xf8] sm:$0xff]   ;;  %v77_v38 = vpack.c.bf16 %v76_v34, %v75_v33  ;;  %v929_v40 = vld [vmem:[#allocation8 + $0x70] sm:$0xff]   ;;  %v933_v44 = vld [vmem:[#allocation8 + $0x68] sm:$0xff]   ;;  %s742_s18 = sshll.u32 %s1076_s17, 4  ;;  %s743_s18 = int_to_ptr.vmem [resolvable:$true] %s742_s18 }
  0x42   :  { %v927_v37 = vld [vmem:[#allocation8 + $0x38] sm:$0xff]   ;;  %v930_v41 = vld [vmem:[#allocation8 + $0xf0] sm:$0xff]   ;;  %v934_v45 = vld [vmem:[#allocation8 + $0xe8] sm:$0xff]   ;;  %v118_v6 = vsub.s32 1, %v113_v5  ;;  %v126_v7 = vsub.s32 3, %v113_v5  ;;  %v114_v8 = vsub.s32 0, %v113_v5  ;;  %p1042_p7 = scmp.lt.s32.totalorder %s743_s18, %s743_s18 }
  0x43   :  { %v928_v39 = vld [vmem:[#allocation8 + $0xb8] sm:$0xff]   ;;  %v931_v42 = vld [vmem:[#allocation8 + $0x30] sm:$0xff]   ;;  %v935_v46 = vld [vmem:[#allocation8 + $0x28] sm:$0xff]   ;;  %v122_v9 = vsub.s32 2, %v113_v5 }
  0x44   :  { %299 = vmatpush1.bf16.msra.mxu0 %v899_v15  ;;  %342 = vmatpush1.bf16.msra.mxu1 %v900_v16  ;;  %v932_v43 = vld [vmem:[#allocation8 + $0xb0] sm:$0xff]   ;;  %v936_v47 = vld [vmem:[#allocation8 + $0xa8] sm:$0xff]   ;;  %v937_v48 = vld [vmem:[#allocation8 + $0x60] sm:$0xff]  }
  0x45   :  { %300 = vmatprep.subr.bf16.mxu0 %v901_v17  ;;  %343 = vmatprep.subr.bf16.mxu1 %v903_v18  ;;  %v938_v49 = vld [vmem:[#allocation8 + $0xe0] sm:$0xff]   ;;  %v941_v52 = vld [vmem:[#allocation8 + $0x58] sm:$0xff]   ;;  %v945_v56 = vld [vmem:[#allocation8 + $0x50] sm:$0xff]  }
  0x46   :  { %v939_v50 = vld [vmem:[#allocation8 + $0x20] sm:$0xff]   ;;  %v942_v53 = vld [vmem:[#allocation8 + $0xd8] sm:$0xff]   ;;  %v946_v57 = vld [vmem:[#allocation8 + $0xd0] sm:$0xff]  }
  0x47   :  { %v940_v51 = vld [vmem:[#allocation8 + $0xa0] sm:$0xff]   ;;  %v943_v54 = vld [vmem:[#allocation8 + $0x18] sm:$0xff]   ;;  %v947_v58 = vld [vmem:[#allocation8 + $0x10] sm:$0xff]  }
  0x48   :  { %301 = vmatpush1.bf16.msra.mxu0 %v905_v19  ;;  %344 = vmatpush1.bf16.msra.mxu1 %v906_v20  ;;  %v944_v55 = vld [vmem:[#allocation8 + $0x98] sm:$0xff]   ;;  %v948_v59 = vld [vmem:[#allocation8 + $0x90] sm:$0xff]   ;;  %v949_v60 = vld [vmem:[#allocation8 + $0x48] sm:$0xff]  }
  0x49   :  { %302 = vmatprep.subr.bf16.mxu0 %v907_v21  ;;  %345 = vmatprep.subr.bf16.mxu1 %v909_v22  ;;  %v950_v61 = vld [vmem:[#allocation8 + $0xc8] sm:$0xff]   ;;  %v953_v0 = vld [vmem:[#allocation8 + $0x40] sm:$0xff]   ;;  %v110_v10 = vld [vmem:[#allocation7] sm:$0xf] }
  0x4a   :  { %v951_v62 = vld [vmem:[#allocation8 + $0x8] sm:$0xff]   ;;  %v954_v1 = vld [vmem:[#allocation8 + $0xc0] sm:$0xff]   ;;  %v119_v13 = vrot.slane %v110_v10, %v118_v6  ;;  %v127_v14 = vrot.slane %v110_v10, %v126_v7  ;;  %v115_v15 = vrot.slane %v110_v10, %v114_v8  ;;  %v123_v16 = vrot.slane %v110_v10, %v122_v9 }
  0x4b   :  { %v952_v63 = vld [vmem:[#allocation8 + $0x88] sm:$0xff]   ;;  %v955_v2 = vld [vmem:[#allocation8] sm:$0xff]  }
  0x4c   :  { %303 = vmatpush1.bf16.msra.mxu0 %v911_v23  ;;  %346 = vmatpush1.bf16.msra.mxu1 %v912_v24  ;;  %v956_v3 = vld [vmem:[#allocation8 + $0x80] sm:$0xff]  }
  0x4d   :  { %304 = vmatprep.subr.bf16.mxu0 %v913_v25  ;;  %347 = vmatprep.subr.bf16.mxu1 %v915_v26 }
  0x50   :  { %305 = vmatpush1.bf16.msra.mxu0 %v917_v27  ;;  %348 = vmatpush1.bf16.msra.mxu1 %v918_v28 }
  0x51   :  { %306 = vmatprep.subr.bf16.mxu0 %v919_v29  ;;  %349 = vmatprep.subr.bf16.mxu1 %v921_v30 }
  0x54   :  { %307 = vmatpush1.bf16.msra.mxu0 %v923_v31  ;;  %350 = vmatpush1.bf16.msra.mxu1 %v924_v32 }
  0x55   :  { %821 = vmatprep.subr.bf16.mxu0 %v925_v35  ;;  %843 = vmatprep.subr.bf16.mxu1 %v926_v36 }
  0x57   :  { %325 = vmatmul.mubr.bf16.vlgmr.msra.gmra.mxu0 %v77_v38  ;;  %368 = vmatmul.mubr.bf16.vlgmr.msra.gmra.mxu1 %v77_v38 }
  0x58   :  { %822 = vmatpush3.bf16.msra.mxu0 %v927_v37  ;;  %844 = vmatpush3.bf16.msra.mxu1 %v928_v39 }
  0x59   :  { %823 = vmatprep.subr.bf16.mxu0 %v929_v40  ;;  %845 = vmatprep.subr.bf16.mxu1 %v930_v41 }
  0x5c   :  { %824 = vmatpush3.bf16.msra.mxu0 %v931_v42  ;;  %846 = vmatpush3.bf16.msra.mxu1 %v932_v43 }
  0x5d   :  { %825 = vmatprep.subr.bf16.mxu0 %v933_v44  ;;  %847 = vmatprep.subr.bf16.mxu1 %v934_v45  ;;  %v788_v45 = vld [vmem:[%s1135_s4] ss:$0 sm:$0xff]  ;;  %s1037_s4 = scalar_lea.vmem %s743_s18, 256 }
  0x5e   :  { %p1038_p6 = scmp.ne.s32.totalorder %s743_s18, %s1037_s4  ;;  %p1043_p8 = scmp.lt.s32.totalorder %s1037_s4, %s1037_s4 }
  0x60   :  { %826 = vmatpush3.bf16.msra.mxu0 %v935_v46  ;;  %848 = vmatpush3.bf16.msra.mxu1 %v936_v47  ;;  %p1044_p9 = por %p1043_p8, %p1042_p7 }
  0x61   :  { %827 = vmatprep.subr.bf16.mxu0 %v937_v48  ;;  %849 = vmatprep.subr.bf16.mxu1 %v938_v49 }
  0x62   :  { %p1045_p10 = pnand %p1044_p9, %p1038_p6 }
  0x64   :  { %828 = vmatpush3.bf16.msra.mxu0 %v939_v50  ;;  %850 = vmatpush3.bf16.msra.mxu1 %v940_v51 }
  0x65   :  { %829 = vmatprep.subr.bf16.mxu0 %v941_v52  ;;  %851 = vmatprep.subr.bf16.mxu1 %v942_v53 }
  0x68   :  { %830 = vmatpush3.bf16.msra.mxu0 %v943_v54  ;;  %852 = vmatpush3.bf16.msra.mxu1 %v944_v55 }
  0x69   :  { %831 = vmatprep.subr.bf16.mxu0 %v945_v56  ;;  %853 = vmatprep.subr.bf16.mxu1 %v946_v57 }
  0x6c   :  { %832 = vmatpush3.bf16.msra.mxu0 %v947_v58  ;;  %854 = vmatpush3.bf16.msra.mxu1 %v948_v59 }
  0x6d   :  { %833 = vmatprep.subr.bf16.mxu0 %v949_v60  ;;  %855 = vmatprep.subr.bf16.mxu1 %v950_v61 }
  0x70   :  { %834 = vmatpush3.bf16.msra.mxu0 %v951_v62  ;;  %856 = vmatpush3.bf16.msra.mxu1 %v952_v63 }
  0x71   :  { %835 = vmatprep.subr.bf16.mxu0 %v953_v0  ;;  %857 = vmatprep.subr.bf16.mxu1 %v954_v1 }
  0x74   :  { %836 = vmatpush3.bf16.msra.mxu0 %v955_v2  ;;  %858 = vmatpush3.bf16.msra.mxu1 %v956_v3 }
 0x117   :  { %v326_v11 = vpop.f32.mrf.mxu0  ;;  %v369_v12 = vpop.f32.mrf.mxu1 }
 0x118   :  { %v327_v25 = vadd.f32 %v326_v11, %v115_v15  ;;  %v370_v26 = vadd.f32 %v369_v12, %v123_v16 }
 0x119   :  { %v328_v17 = vpop.f32.mrf.mxu0  ;;  %v371_v18 = vpop.f32.mrf.mxu1 }
 0x11a   :  { %v329_v21 = vadd.f32 %v328_v17, %v119_v13  ;;  %v372_v22 = vadd.f32 %v371_v18, %v127_v14  ;;  %v378_v37 = vmax.f32 %v327_v25, 0.0  ;;  %v380_v38 = vmax.f32 %v370_v26, 0.0 }
 0x11b   :  { %v330_v19 = vpop.f32.mrf.mxu0  ;;  %v373_v20 = vpop.f32.mrf.mxu1 }
 0x11c   :  { %v331_v23 = vadd.f32 %v330_v19, %v115_v15  ;;  %v374_v24 = vadd.f32 %v373_v20, %v123_v16  ;;  %v379_v33 = vmax.f32 %v329_v21, 0.0  ;;  %v381_v34 = vmax.f32 %v372_v22, 0.0 }
 0x11d   :  { %v332_v27 = vpop.f32.mrf.mxu0  ;;  %v375_v28 = vpop.f32.mrf.mxu1 }
 0x11e   :  { %v333_v29 = vadd.f32 %v332_v27, %v119_v13  ;;  %v376_v30 = vadd.f32 %v375_v28, %v127_v14  ;;  %v382_v31 = vmax.f32 %v331_v23, 0.0  ;;  %v384_v32 = vmax.f32 %v374_v24, 0.0 }
 0x120   :  { %v383_v35 = vmax.f32 %v333_v29, 0.0  ;;  %v385_v36 = vmax.f32 %v376_v30, 0.0  ;;  %v386_v41 = vpack.c.bf16 %v382_v31, %v378_v37  ;;  %v388_v42 = vpack.c.bf16 %v384_v32, %v380_v38 }
 0x122   :  { %v387_v39 = vpack.c.bf16 %v383_v35, %v379_v33  ;;  %v389_v40 = vpack.c.bf16 %v385_v36, %v381_v34 }
 0x124   :  { %685 = vmatprep.mubr.bf16.mxu0 %v387_v39  ;;  %726 = vmatprep.mubr.bf16.mxu1 %v389_v40 }
 0x125   :  { %686 = vmatmul.mubr.bf16.vlgmr.msra.gmra.mxu0 %v386_v41  ;;  %727 = vmatmul.mubr.bf16.vlgmr.msra.gmra.mxu1 %v388_v42 }
 0x1e5   :  { %v837_v43 = vpop.f32.mrf.mxu0  ;;  %v859_v44 = vpop.f32.mrf.mxu1 }
 0x1e7   :  { %v838_v46 = vpop.f32.mrf.mxu0  ;;  %v860_v47 = vpop.f32.mrf.mxu1 }
 0x1e8   :  { %v839_v48 = vadd.f32 %v838_v46, %v837_v43  ;;  %v861_v52 = vadd.f32 %v860_v47, %v859_v44 }
 0x1e9   :  { %v840_v49 = vpop.f32.mrf.mxu0  ;;  %v862_v50 = vpop.f32.mrf.mxu1 }
 0x1ea   :  { %v688_v51 = vadd.f32 %v839_v48, %v788_v45 }
 0x1eb   :  { %v841_v53 = vpop.f32.mrf.mxu0  ;;  %v863_v54 = vpop.f32.mrf.mxu1 }
 0x1ec   :  { %v729_v55 = vadd.f32 %v861_v52, %v688_v51  ;;  %v842_v56 = vadd.f32 %v841_v53, %v840_v49  ;;  %v864_v58 = vadd.f32 %v863_v54, %v862_v50 }
 0x1ee   :  { %735 = vst [vmem:[#allocation10] sm:$0xff] %v729_v55  ;;  %v691_v57 = vadd.f32 %v842_v56, %v788_v45 }
 0x1f0   :  { %v732_v59 = vadd.f32 %v864_v58, %v691_v57 }
 0x1f2   :  { %736 = vst [vmem:[#allocation10 + $0x8] sm:$0xff] %v732_v59 }
 0x1f3   :  { %1048 = shalt.err (!%p1045_p10)
}
 0x1f4   :  { %748 = dma.vmem_to_hbm [thread:$0]  %s743_s18, 256, %s1136_s5, [#allocation4], %s1069_s28, %s1069_s28, %s1070_s29  }
 0x1f5   :  { %1063 = dma.done.wait [#allocation4], 256  }
 0x1f6   :  { %1064 = vsyncadd [#allocation4], 4294967040 }
 0x1f7   :  { %752 = vsyncpa [#allocation3], 1 }
 0x1f8   :  { %753 = vsyncpa [#allocation6], 1 }
 0x1f9   :  { %754 = vsyncpa [#allocation9], 1 }
 0x1fa   :  { %755 = vsyncpa [#allocation4], 1 }

</bundles_post_ra>
